<compile_context>
chip_gen: v7x
topology: tpu7x:2x2x1
jax: 0.10.0
libtpu: 0.0.40
codegen_flags: <defaults>
</compile_context>

<pallas_src>
import functools

import jax
import jax.numpy as jnp
from jax.experimental import pallas as pl
from jax.experimental.pallas import tpu as pltpu


def _smf_kernel(wt_ref, b_ref, ls_ref, rs_ref, out_ref):
    """One batch tile of BLOCK_B index pairs.

    wt_ref : (D, n)  f32  VMEM-resident transposed embedding table
    b_ref  : (n, 1)  f32  VMEM-resident bias table
    ls_ref : (1, BT) i32  left indices for this tile
    rs_ref : (1, BT) i32  right indices for this tile
    out_ref: (1, BT) f32  lane-dense output slab
    """
    n = wt_ref.shape[1]
    bt = ls_ref.shape[1]

    # One-hot selection matrices (n, BT): sel[j, b] = (idx[b] == j).
    iota_n = jax.lax.broadcasted_iota(jnp.int32, (n, bt), 0)
    sel_l = (iota_n == ls_ref[...]).astype(jnp.float32)
    sel_r = (iota_n == rs_ref[...]).astype(jnp.float32)

    # Gather the embedding rows via MXU:  (D, n) @ (n, BT) -> (D, BT).
    lw = jnp.dot(wt_ref[...], sel_l, preferred_element_type=jnp.float32)
    rw = jnp.dot(wt_ref[...], sel_r, preferred_element_type=jnp.float32)

    # Per-pair dot product over the embedding dim -> (1, BT), lane-dense.
    dot = jnp.sum(lw * rw, axis=0, keepdims=True)

    # Bias gather: (n, 1) broadcast against (n, BT), reduce over n -> (1, BT).
    lb = jnp.sum(sel_l * b_ref[...], axis=0, keepdims=True)
    rb = jnp.sum(sel_r * b_ref[...], axis=0, keepdims=True)

    out_ref[...] = dot + lb + rb


@functools.partial(jax.jit, static_argnames=("block_b",))
def symmetric_matrix_factorization(W, b, ls, rs, *, block_b=256):
    """W: (n, D) f32, b: (n, 1) f32, ls/rs: (B,) int -> (B,) f32."""
    n, D = W.shape
    B = ls.shape[0]

    # Safety: clamp indices so a bad index can never drive an OOB access.
    ls = jnp.clip(ls.astype(jnp.int32), 0, n - 1)
    rs = jnp.clip(rs.astype(jnp.int32), 0, n - 1)

    # Pad the batch up to a multiple of the lane-dense tile.
    num_blocks = pl.cdiv(B, block_b)
    b_padded = num_blocks * block_b
    pad = b_padded - B
    if pad:
        zeros = jnp.zeros((pad,), jnp.int32)
        ls = jnp.concatenate([ls, zeros])
        rs = jnp.concatenate([rs, zeros])
    ls2 = ls.reshape(1, b_padded)
    rs2 = rs.reshape(1, b_padded)

    # Resident tables: W transposed so the gather is a plain (D,n)@(n,BT) matmul.
    wt = W.astype(jnp.float32).T            # (D, n)
    b2 = b.astype(jnp.float32).reshape(n, 1)

    # VMEM budget: resident tables + streamed index/output slabs + temporaries.
    table_bytes = (D * n + n) * 4
    stream_bytes = 3 * block_b * 4 * 2                 # ls, rs, out (double-buffered)
    temps_bytes = (2 * n + 2 * D + 4) * block_b * 4    # sel_l/r, lw/rw, partials
    vmem_limit = min(48 * 1024 * 1024,
                     max(16 * 1024 * 1024,
                         4 * (table_bytes + stream_bytes + temps_bytes)))

    out = pl.pallas_call(
        _smf_kernel,
        out_shape=jax.ShapeDtypeStruct((1, b_padded), jnp.float32),
        grid=(num_blocks,),
        in_specs=[
            # Constant block index -> stays VMEM-resident across the whole grid.
            pl.BlockSpec((D, n), lambda i: (0, 0)),
            pl.BlockSpec((n, 1), lambda i: (0, 0)),
            # Per-tile index slabs (lane-dense, multiple of 128).
            pl.BlockSpec((1, block_b), lambda i: (0, i)),
            pl.BlockSpec((1, block_b), lambda i: (0, i)),
        ],
        out_specs=pl.BlockSpec((1, block_b), lambda i: (0, i)),
        compiler_params=pltpu.CompilerParams(
            dimension_semantics=("parallel",),   # no carried state -> shard on v7x
            vmem_limit_bytes=vmem_limit,
        ),
    )(wt, b2, ls2, rs2)

    return out.reshape(b_padded)[:B]


def _reference(W, b, ls, rs):
    return (W[ls] * W[rs]).sum(axis=1) + b[ls, 0] + b[rs, 0]


if __name__ == "__main__":
    n, D = 16, 32   # vocab size, embedding dim

    key = jax.random.PRNGKey(0)
    kW, kb, kl, kr = jax.random.split(key, 4)

    # torch.nn.Embedding default init is N(0, 1) for both W and b.
    W = jax.random.normal(kW, (n, D), dtype=jnp.float32)
    b = jax.random.normal(kb, (n, 1), dtype=jnp.float32)

    # Small batch (single grid step, padded to the tile).
    B_small = 8
    ls = jax.random.randint(kl, (B_small,), 0, n, dtype=jnp.int32)
    rs = jax.random.randint(kr, (B_small,), 0, n, dtype=jnp.int32)
    out = jax.block_until_ready(
        symmetric_matrix_factorization(W, b, ls, rs, block_b=128))
    ref = _reference(W, b, ls, rs)
    assert out.shape == (B_small,)
    assert jnp.allclose(out, ref, atol=1e-5, rtol=1e-5)

    # Slightly larger, non-multiple batch to exercise multi-block grid + padding.
    B_big = 300
    kl2, kr2 = jax.random.split(jax.random.PRNGKey(1))
    ls2 = jax.random.randint(kl2, (B_big,), 0, n, dtype=jnp.int32)
    rs2 = jax.random.randint(kr2, (B_big,), 0, n, dtype=jnp.int32)
    out2 = jax.block_until_ready(
        symmetric_matrix_factorization(W, b, ls2, rs2, block_b=128))
    ref2 = _reference(W, b, ls2, rs2)
    assert out2.shape == (B_big,)
    assert jnp.allclose(out2, ref2, atol=1e-5, rtol=1e-5)

    print("KERNEL_OK")
</pallas_src>

<mosaic_0001>
module attributes {stable_mosaic.version = 11 : i64} {
  func.func @_smf_kernel(%arg0: i32, %arg1: memref<32x16xf32, #tpu.memory_space<vmem>>, %arg2: memref<16x1xf32, #tpu.memory_space<vmem>>, %arg3: memref<1x128xi32, #tpu.memory_space<vmem>>, %arg4: memref<1x128xi32, #tpu.memory_space<vmem>>, %arg5: memref<1x128xf32, #tpu.memory_space<vmem>>) attributes {dimension_semantics = [#tpu.dimension_semantics<parallel>], iteration_bounds = array<i64: 1>, scalar_prefetch = 0 : i64, scratch_operands = 0 : i64, tpu.core_type = #tpu.core_type<tc>, window_params = [{pipeline_mode = #tpu.pipeline_mode<synchronous>, transform_indices = @transform_0, window_bounds = array<i64: 32, 16>}, {pipeline_mode = #tpu.pipeline_mode<synchronous>, transform_indices = @transform_1, window_bounds = array<i64: 16, 1>}, {transform_indices = @transform_2, window_bounds = array<i64: 1, 128>}, {transform_indices = @transform_3, window_bounds = array<i64: 1, 128>}, {transform_indices = @transform_4, window_bounds = array<i64: 1, 128>}]} {
    %0 = tpu.iota {dimensions = array<i32: 0>} : vector<16x128xi32>
    %c0 = arith.constant 0 : index
    %c0_0 = arith.constant 0 : index
    %1 = vector.load %arg3[%c0, %c0_0] : memref<1x128xi32, #tpu.memory_space<vmem>>, vector<1x128xi32>
    %2 = vector.broadcast %1 : vector<1x128xi32> to vector<16x128xi32>
    %3 = arith.cmpi eq, %0, %2 : vector<16x128xi32>
    %4 = arith.extui %3 : vector<16x128xi1> to vector<16x128xi32>
    %5 = arith.sitofp %4 : vector<16x128xi32> to vector<16x128xf32>
    %c0_1 = arith.constant 0 : index
    %c0_2 = arith.constant 0 : index
    %6 = vector.load %arg4[%c0_1, %c0_2] : memref<1x128xi32, #tpu.memory_space<vmem>>, vector<1x128xi32>
    %7 = vector.broadcast %6 : vector<1x128xi32> to vector<16x128xi32>
    %8 = arith.cmpi eq, %0, %7 : vector<16x128xi32>
    %9 = arith.extui %8 : vector<16x128xi1> to vector<16x128xi32>
    %10 = arith.sitofp %9 : vector<16x128xi32> to vector<16x128xf32>
    %c0_3 = arith.constant 0 : index
    %c0_4 = arith.constant 0 : index
    %11 = vector.load %arg1[%c0_3, %c0_4] : memref<32x16xf32, #tpu.memory_space<vmem>>, vector<32x16xf32>
    %cst = arith.constant dense<0.000000e+00> : vector<32x128xf32>
    %12 = tpu.matmul %11, %5, %cst {dimension_numbers = #tpu.dot_dimension_numbers<[1], [0], [0], [1], [0, 0, 1, 1], [], []>} : vector<32x16xf32>, vector<16x128xf32>, vector<32x128xf32> -> vector<32x128xf32>
    %c0_5 = arith.constant 0 : index
    %c0_6 = arith.constant 0 : index
    %13 = vector.load %arg1[%c0_5, %c0_6] : memref<32x16xf32, #tpu.memory_space<vmem>>, vector<32x16xf32>
    %cst_7 = arith.constant dense<0.000000e+00> : vector<32x128xf32>
    %14 = tpu.matmul %13, %10, %cst_7 {dimension_numbers = #tpu.dot_dimension_numbers<[1], [0], [0], [1], [0, 0, 1, 1], [], []>} : vector<32x16xf32>, vector<16x128xf32>, vector<32x128xf32> -> vector<32x128xf32>
    %15 = arith.mulf %12, %14 : vector<32x128xf32>
    %cst_8 = arith.constant dense<0.000000e+00> : vector<128xf32>
    %16 = vector.multi_reduction <add>, %15, %cst_8 [0] : vector<32x128xf32> to vector<128xf32>
    %17 = vector.shape_cast %16 : vector<128xf32> to vector<1x128xf32>
    %c0_9 = arith.constant 0 : index
    %c0_10 = arith.constant 0 : index
    %18 = vector.load %arg2[%c0_9, %c0_10] : memref<16x1xf32, #tpu.memory_space<vmem>>, vector<16x1xf32>
    %19 = vector.broadcast %18 : vector<16x1xf32> to vector<16x128xf32>
    %20 = arith.mulf %5, %19 : vector<16x128xf32>
    %cst_11 = arith.constant dense<0.000000e+00> : vector<128xf32>
    %21 = vector.multi_reduction <add>, %20, %cst_11 [0] : vector<16x128xf32> to vector<128xf32>
    %22 = vector.shape_cast %21 : vector<128xf32> to vector<1x128xf32>
    %c0_12 = arith.constant 0 : index
    %c0_13 = arith.constant 0 : index
    %23 = vector.load %arg2[%c0_12, %c0_13] : memref<16x1xf32, #tpu.memory_space<vmem>>, vector<16x1xf32>
    %24 = vector.broadcast %23 : vector<16x1xf32> to vector<16x128xf32>
    %25 = arith.mulf %10, %24 : vector<16x128xf32>
    %cst_14 = arith.constant dense<0.000000e+00> : vector<128xf32>
    %26 = vector.multi_reduction <add>, %25, %cst_14 [0] : vector<16x128xf32> to vector<128xf32>
    %27 = vector.shape_cast %26 : vector<128xf32> to vector<1x128xf32>
    %28 = arith.addf %17, %22 : vector<1x128xf32>
    %29 = arith.addf %28, %27 : vector<1x128xf32>
    %c0_15 = arith.constant 0 : index
    %c0_16 = arith.constant 0 : index
    %30 = vector.load %arg5[%c0_15, %c0_16] : memref<1x128xf32, #tpu.memory_space<vmem>>, vector<1x128xf32>
    tpu.vector_store %arg5[%c0_15, %c0_16], %29 {strides = array<i32>} : memref<1x128xf32, #tpu.memory_space<vmem>>, vector<1x128xf32>,
    return
  }
  func.func @transform_0(%arg0: i32) -> (i32, i32) {
    %c0_i32 = arith.constant 0 : i32
    %c0_i32_0 = arith.constant 0 : i32
    %c0_i32_1 = arith.constant 0 : i32
    return %c0_i32, %c0_i32_0 : i32, i32
  }
  func.func @transform_1(%arg0: i32) -> (i32, i32) {
    %c0_i32 = arith.constant 0 : i32
    %c0_i32_0 = arith.constant 0 : i32
    %c0_i32_1 = arith.constant 0 : i32
    return %c0_i32, %c0_i32_0 : i32, i32
  }
  func.func @transform_2(%arg0: i32) -> (i32, i32) {
    %c0_i32 = arith.constant 0 : i32
    %c0_i32_0 = arith.constant 0 : i32
    return %c0_i32, %arg0 : i32, i32
  }
  func.func @transform_3(%arg0: i32) -> (i32, i32) {
    %c0_i32 = arith.constant 0 : i32
    %c0_i32_0 = arith.constant 0 : i32
    return %c0_i32, %arg0 : i32, i32
  }
  func.func @transform_4(%arg0: i32) -> (i32, i32) {
    %c0_i32 = arith.constant 0 : i32
    %c0_i32_0 = arith.constant 0 : i32
    return %c0_i32, %arg0 : i32, i32
  }
}

</mosaic_0001>

<bundles_post_ra>
// kernel: symmetric_matrix_factorization.1
= control target key start
LH: loop header
LB: loop body
LE: loop exit
PB: predicated region body
PF: predicated region fallthrough
CT: control target
= control target key end

     0   :  { %v17_v0 = vlaneseq  ;;  %vm46_vm0 = vcmask 130048   ;;  %v341_v5 = vmov 0   ;;  %v342_v9 = vmov 1.0|1.0   ;;  %s412_s2 = inlined_call_operand.vmem [shape: s32[1,128], index: 2, kind: input, shape index: {}]   ;;  %s413_s3 = inlined_call_operand.vmem [shape: s32[1,128], index: 3, kind: input, shape index: {}]   ;;  %s414_s0 = inlined_call_operand.vmem [shape: f32[32,16], index: 0, kind: input, shape index: {}]   ;;  %s415_s1 = inlined_call_operand.vmem [shape: f32[16,1], index: 1, kind: input, shape index: {}]   ;;  %s416_s4 = inlined_call_operand.vmem [shape: f32[1,128], index: 4, kind: output, shape index: {}]  }
   0x1   :  { %v279_v1 = vld [vmem:[%s412_s2] ss:$0 sm:$0xff]  ;;  %340 = vset.pattern.permute.xlu0 %v341_v5  ;;  %v243_v8 = vld [vmem:[%s415_s1 + $0x8] sm:$0xff]  ;;  %v44_v11 = vld [vmem:[%s414_s0 + $0x10] sm:$0xff]  ;;  %v343_v13 = vmov 0.0  }
   0x2   :  { %v42_v2 = vld [vmem:[%s414_s0] sm:$0xff]  ;;  %v18_v3 = vshrl.u32 %v17_v0, 7  ;;  %v43_v10 = vld [vmem:[%s414_s0 + $0x8] sm:$0xff]  ;;  %v45_v12 = vld [vmem:[%s414_s0 + $0x18] sm:$0xff] }
   0x3   :  { %v282_v4 = vld [vmem:[%s413_s3] ss:$0 sm:$0xff]  ;;  %313 = vmatprep.mubr.msk.f32.mxu0 %vm46_vm0, %v42_v2  ;;  %323 = vmatprep.mubr.msk.f32.mxu1 %vm46_vm0, %v42_v2 }
   0x4   :  { %v242_v6 = vld [vmem:[%s415_s1] sm:$0xff]  ;;  %v19_v7 = vadd.s32 8, %v18_v3  ;;  %vm25_vm1 = vcmp.eq.s32.totalorder %v18_v3, %v279_v1  ;;  %vm36_vm2 = vcmp.eq.s32.totalorder %v18_v3, %v282_v4 }
   0x5   :  { %246 = vperm.xlu0 %340, %v242_v6   ;;  %v280_v14 = vsel %vm25_vm1, 1.0, %v343_v13  ;;  %v283_v15 = vsel %vm36_vm2, 1.0, %v343_v13 }
   0x6   :  { %vm26_vm3 = vcmp.eq.s32.totalorder %v19_v7, %v279_v1  ;;  %vm37_vm4 = vcmp.eq.s32.totalorder %v19_v7, %v282_v4 }
   0x7   :  { %vm329_vm5 = vmpackc.low %vm26_vm3, %vm25_vm1  ;;  %v281_v17 = vsel %vm26_vm3, 1.0, %v343_v13  ;;  %v284_v18 = vsel %vm37_vm4, 1.0, %v343_v13 }
   0x8   :  { %330 = vmatprep.subr.msk.bf16.mxu0 %vm329_vm5, %v342_v9  ;;  %vm333_vm6 = vmpackc.low %vm37_vm4, %vm36_vm2 }
   0x9   :  { %251 = vperm.xlu0 %340, %v243_v8   ;;  %334 = vmatprep.subr.msk.bf16.mxu1 %vm333_vm6, %v342_v9 }
   0xa   :  { %332 = vmatpush3.bf16.msk.msra.mxu0 %vm329_vm5, %v342_v9  ;;  %336 = vmatpush3.bf16.msk.msra.mxu1 %vm333_vm6, %v342_v9 }
   0xd   :  { %314 = vmatmul.mubr.msk.f32.vlgmr.msra.gmra.mrb[0].mxu0 %vm46_vm0, %v43_v10  ;;  %324 = vmatmul.mubr.msk.f32.vlgmr.msra.gmra.mrb[0].mxu1 %vm46_vm0, %v43_v10 }
   0xe   :  { %316 = vmatprep.mubr.msk.f32.mxu0 %vm46_vm0, %v44_v11  ;;  %326 = vmatprep.mubr.msk.f32.mxu1 %vm46_vm0, %v44_v11 }
  0x11   :  { %317 = vmatmul.mubr.msk.f32.gmra.mrb[2].mxu0 %vm46_vm0, %v45_v12  ;;  %327 = vmatmul.mubr.msk.f32.gmra.mrb[2].mxu1 %vm46_vm0, %v45_v12 }
  0x84   :  { %v247_v16 = vpop.permute.xlu0 %246 }
  0x85   :  { %v254_v19 = vmul.f32 %v280_v14, %v247_v16  ;;  %v263_v20 = vmul.f32 %v283_v15, %v247_v16 }
  0x88   :  { %v252_v21 = vpop.permute.xlu0 %251 }
  0x89   :  { %v255_v22 = vmul.f32 %v281_v17, %v252_v21  ;;  %v264_v23 = vmul.f32 %v284_v18, %v252_v21 }
  0x8b   :  { %v256_v24 = vadd.f32 %v255_v22, %v254_v19  ;;  %v265_v25 = vadd.f32 %v264_v23, %v263_v20 }
  0x8d   :  { %v257_v31 = vrot.slane %v256_v24, 4  ;;  %v266_v34 = vrot.slane %v265_v25, 4 }
  0x8f   :  { %v258_v40 = vadd.f32 %v257_v31, %v256_v24  ;;  %v267_v42 = vadd.f32 %v266_v34, %v265_v25 }
  0x91   :  { %v259_v44 = vrot.slane %v258_v40, 2  ;;  %v268_v46 = vrot.slane %v267_v42, 2 }
  0x93   :  { %v260_v48 = vadd.f32 %v259_v44, %v258_v40  ;;  %v269_v50 = vadd.f32 %v268_v46, %v267_v42 }
  0x95   :  { %v261_v52 = vrot.slane %v260_v48, 1  ;;  %v270_v54 = vrot.slane %v269_v50, 1 }
  0x97   :  { %v262_v56 = vadd.f32 %v261_v52, %v260_v48  ;;  %v271_v58 = vadd.f32 %v270_v54, %v269_v50 }
  0xe0   :  { %v315_v26 = vpop.f32.mrb[0].mxu0  ;;  %v325_v27 = vpop.f32.mrb[0].mxu1 }
  0xe1   :  { %v125_v28 = vpop.f32.mrb[1].mxu0  ;;  %v230_v29 = vmul.f32 %v325_v27, %v315_v26  ;;  %v210_v30 = vpop.f32.mrb[1].mxu1 }
  0xe2   :  { %v229_v32 = vmul.f32 %v210_v30, %v125_v28 }
  0xe4   :  { %v318_v33 = vpop.f32.mrb[2].mxu0  ;;  %v233_v35 = vadd.f32 %v230_v29, %v229_v32  ;;  %v328_v36 = vpop.f32.mrb[2].mxu1 }
  0xe5   :  { %v135_v37 = vpop.f32.mrb[3].mxu0  ;;  %v232_v38 = vmul.f32 %v328_v36, %v318_v33  ;;  %v220_v39 = vpop.f32.mrb[3].mxu1 }
  0xe6   :  { %v231_v41 = vmul.f32 %v220_v39, %v135_v37 }
  0xe8   :  { %v234_v43 = vadd.f32 %v233_v35, %v231_v41 }
  0xea   :  { %v235_v45 = vadd.f32 %v234_v43, %v232_v38 }
  0xec   :  { %v236_v47 = vrot.slane %v235_v45, 4 }
  0xee   :  { %v237_v49 = vadd.f32 %v236_v47, %v235_v45 }
  0xf0   :  { %v238_v51 = vrot.slane %v237_v49, 2 }
  0xf2   :  { %v239_v53 = vadd.f32 %v238_v51, %v237_v49 }
  0xf4   :  { %v240_v55 = vrot.slane %v239_v53, 1 }
  0xf6   :  { %v241_v57 = vadd.f32 %v240_v55, %v239_v53 }
  0xf8   :  { %v272_v59 = vadd.f32 %v262_v56, %v241_v57 }
  0xfa   :  { %v273_v60 = vadd.f32 %v272_v59, %v271_v58 }
  0xfc   :  { %274 = vst [vmem:[%s416_s4] sm:$0x1] %v273_v60 }

</bundles_post_ra>
